<compile_context>
chip_gen: v7x
topology: tpu7x:2x2x1
jax: 0.10.0
libtpu: 0.0.40
codegen_flags: <defaults>
</compile_context>

<pallas_src>
import functools

import jax
import jax.numpy as jnp
from jax.experimental import pallas as pl
from jax.experimental.pallas import tpu as pltpu


# ----------------------------------------------------------------------------
# helpers
# ----------------------------------------------------------------------------
def _round_up(x: int, m: int) -> int:
    return ((x + m - 1) // m) * m


def _cdiv(a: int, b: int) -> int:
    return -(-a // b)


def _choose_tile(dim: int, granularity: int, max_tile: int) -> int:
    """Pick a tile size that is a multiple of `granularity`, <= max_tile, and
    minimizes round-up waste of the padded dimension (instead of clamping a
    fixed tile and rounding the problem up to it)."""
    padded_min = _round_up(max(dim, 1), granularity)
    if padded_min <= max_tile:
        return padded_min                      # single tile, minimal padding
    n_tiles = _cdiv(padded_min, max_tile)
    return _round_up(_cdiv(padded_min, n_tiles), granularity)


def _device_tile_defaults():
    """(max_tm, max_tn, max_tk, vmem_limit_bytes) per TPU generation."""
    try:
        kind = jax.devices()[0].device_kind.lower()
    except Exception:  # pragma: no cover - CPU/interpret fallback
        kind = ""
    if "v7" in kind:
        # 64 MiB VMEM per TC: medium tiles already compute-bound at 3.2 TB/s.
        return 640, 768, 1024, 48 * 1024 * 1024
    if "v6" in kind:
        # Highest ridge (~680 FLOP/B); big tiles, 128 MiB physical VMEM.
        return 1024, 1024, 1024, 64 * 1024 * 1024
    # v5e / v5p / unknown: 512x512 (AI~256 FLOP/B) reaches the MXU roofline.
    return 512, 512, 1024, 32 * 1024 * 1024


# ----------------------------------------------------------------------------
# kernel: one (tm, tn) output tile, reduced over the K grid axis
# ----------------------------------------------------------------------------
def _linear_cast_kernel(x_ref, w_ref, b_ref, o_ref, acc_ref):
    """
    x_ref:   (tm, tk)  native activation dtype (cast to MXU dtype in-kernel)
    w_ref:   (tk, tn)  compute dtype (bf16), already (D_in, D_out) layout
    b_ref:   (1,  tn)  f32
    o_ref:   (tm, tn)  target dtype (bf16)
    acc_ref: (tm, tn)  f32 VMEM accumulator scratch
    """
    k = pl.program_id(2)

    # In-kernel activation cast (e.g. f32 HBM -> bf16 MXU operand); avoids a
    # separate, un-hidden cast+pad pass over x in the wrapper.
    x = x_ref[...].astype(w_ref.dtype)
    partial = jnp.dot(x, w_ref[...], preferred_element_type=jnp.float32)

    @pl.when(k == 0)
    def _():
        # First K step: overwrite (no zero-init RMW) and fold the bias in.
        acc_ref[...] = partial + b_ref[...]

    @pl.when(k > 0)
    def _():
        acc_ref[...] += partial

    @pl.when(k == pl.num_programs(2) - 1)
    def _():
        # ToWeightsDType: cast the Linear output to the weights' dtype before
        # the lane-dense store.
        o_ref[...] = acc_ref[...].astype(o_ref.dtype)


# ----------------------------------------------------------------------------
# jitted per-call path (pad-if-needed -> pallas -> slice), shapes static
# ----------------------------------------------------------------------------
@functools.partial(
    jax.jit,
    static_argnames=("tm", "tn", "tk", "d_out", "out_dtype", "vmem_limit"))
def _linear_cast(x2d, wt, b2d, *, tm, tn, tk, d_out, out_dtype, vmem_limit):
    m, d_in = x2d.shape
    kp, np_pad = wt.shape

    mp = _round_up(m, tm)
    # Pad x only when the chosen tiles require it.  K must be zero-padded so
    # the (zero-padded) weight rows never meet garbage activations.
    if (mp, kp) != (m, d_in):
        x2d = jnp.pad(x2d, ((0, mp - m), (0, kp - d_in)))

    grid = (mp // tm, np_pad // tn, kp // tk)

    out = pl.pallas_call(
        _linear_cast_kernel,
        out_shape=jax.ShapeDtypeStruct((mp, np_pad), out_dtype),
        grid_spec=pltpu.PrefetchScalarGridSpec(
            num_scalar_prefetch=0,
            grid=grid,
            in_specs=[
                # If a trace ever shows exposed DMA on the K loop, add
                # pipeline_mode=pl.Buffered(3) to the x / W specs (VMEM
                # headroom exists at these tile sizes except the largest
                # v7x configs).
                pl.BlockSpec((tm, tk), lambda i, j, k: (i, k)),   # x tile
                pl.BlockSpec((tk, tn), lambda i, j, k: (k, j)),   # W^T tile
                pl.BlockSpec((1, tn), lambda i, j, k: (0, j)),    # bias tile
            ],
            out_specs=pl.BlockSpec((tm, tn), lambda i, j, k: (i, j)),
            scratch_shapes=[pltpu.VMEM((tm, tn), jnp.float32)],
        ),
        compiler_params=pltpu.CompilerParams(
            # K (reduction) last and "arbitrary"; M/N independent -> "parallel"
            # so the grid can shard across v7x's two TensorCores.
            dimension_semantics=("parallel", "parallel", "arbitrary"),
            vmem_limit_bytes=vmem_limit,
        ),
    )(x2d, wt, b2d)

    return out[:m, :d_out]


# ----------------------------------------------------------------------------
# module wrapper
# ----------------------------------------------------------------------------
class ToWeightsDTypeLinear:
    """Pallas equivalent of ToWeightsDType(nn.Linear(d_in, d_out), dtype):
    y = (x @ W.T + b).astype(dtype).

    The weight is transposed / cast / padded ONCE at construction (static
    Linear parameter); the per-call path only touches x.
    """

    def __init__(self, weight, bias, dtype=jnp.bfloat16,
                 compute_dtype=jnp.bfloat16,
                 max_tm=None, max_tn=None, max_tk=None, vmem_limit=None):
        d_out, d_in = weight.shape
        self.d_in, self.d_out = int(d_in), int(d_out)
        self.dtype = dtype

        dm, dn, dk, dv = _device_tile_defaults()
        # Heuristic: traffic = K*M*N*(bytes_x/tn + bytes_w/tm); with f32 x and
        # bf16 W the optimum mildly favours tn >= tm (v7x default already is).
        self.max_tm = max_tm or dm
        tn_max = max_tn or dn
        tk_max = max_tk or dk
        self.vmem_limit = vmem_limit or dv

        # N / K tiles depend only on the weight shape -> fixed here.
        self.tn = _choose_tile(self.d_out, 128, tn_max)
        self.tk = _choose_tile(self.d_in, 128, tk_max)
        self.np_pad = _round_up(self.d_out, self.tn)
        self.kp = _round_up(self.d_in, self.tk)

        # One-time HBM pass: (d_out, d_in) -> (Kp, Np) compute dtype (+ pads).
        wt = jnp.asarray(weight).T.astype(compute_dtype)
        if (self.kp, self.np_pad) != (self.d_in, self.d_out):
            wt = jnp.pad(wt, ((0, self.kp - self.d_in),
                              (0, self.np_pad - self.d_out)))
        b2d = jnp.asarray(bias).reshape(1, self.d_out).astype(jnp.float32)
        if self.np_pad != self.d_out:
            b2d = jnp.pad(b2d, ((0, 0), (0, self.np_pad - self.d_out)))
        self.wt = jax.block_until_ready(wt)
        self.b2d = jax.block_until_ready(b2d)

    def __call__(self, x):
        *lead, d_in = x.shape
        assert d_in == self.d_in, "last dim of x must match Linear D_in"
        m = 1
        for s in lead:
            m *= s
        x2d = x.reshape(m, d_in)

        tm = _choose_tile(m, 16, self.max_tm)
        out = _linear_cast(x2d, self.wt, self.b2d,
                           tm=tm, tn=self.tn, tk=self.tk,
                           d_out=self.d_out, out_dtype=self.dtype,
                           vmem_limit=self.vmem_limit)
        return out.reshape(*lead, self.d_out)


# ----------------------------------------------------------------------------
# self-test
# ----------------------------------------------------------------------------
def _check(x, weight, bias, atol, rtol):
    mod = ToWeightsDTypeLinear(weight, bias, dtype=jnp.bfloat16)
    y = jax.block_until_ready(mod(x))

    d_in = x.shape[-1]
    d_out = weight.shape[0]
    ref = (x.reshape(-1, d_in) @ weight.T + bias).astype(jnp.bfloat16)
    ref = ref.reshape(*x.shape[:-1], d_out)

    assert y.dtype == jnp.bfloat16
    assert y.shape == ref.shape
    assert jnp.allclose(y.astype(jnp.float32), ref.astype(jnp.float32),
                        atol=atol, rtol=rtol), "mismatch vs. reference"
    return y


if __name__ == "__main__":
    key = jax.random.PRNGKey(0)
    k_x, k_w, k_b, k_x2, k_w2, k_b2 = jax.random.split(key, 6)

    # Small shapes consistent with the module: batch=2, seq=8, hidden=32.
    B, S, D_IN, D_OUT = 2, 8, 32, 32
    x = jax.random.normal(k_x, (B, S, D_IN), dtype=jnp.float32)
    weight = jax.random.normal(k_w, (D_OUT, D_IN), dtype=jnp.float32) * 0.05
    bias = jax.random.normal(k_b, (D_OUT,), dtype=jnp.float32) * 0.01
    _check(x, weight, bias, atol=3e-2, rtol=3e-2)

    # Secondary check: non-power-of-two shapes exercising the minimal-waste
    # tile selection (K=640 -> tk=640, zero K padding; N=320 -> 384 padded).
    B2, S2, D_IN2, D_OUT2 = 2, 160, 640, 320
    x2 = jax.random.normal(k_x2, (B2, S2, D_IN2), dtype=jnp.float32)
    weight2 = jax.random.normal(k_w2, (D_OUT2, D_IN2), dtype=jnp.float32) * 0.02
    bias2 = jax.random.normal(k_b2, (D_OUT2,), dtype=jnp.float32) * 0.01
    _check(x2, weight2, bias2, atol=5e-2, rtol=5e-2)

    print("KERNEL_OK")
</pallas_src>

<mosaic_0001>
module attributes {stable_mosaic.version = 11 : i64} {
  func.func @_linear_cast_kernel(%arg0: i32, %arg1: i32, %arg2: i32, %arg3: memref<16x128xf32, #tpu.memory_space<vmem>>, %arg4: memref<128x128xbf16, #tpu.memory_space<vmem>>, %arg5: memref<1x128xf32, #tpu.memory_space<vmem>>, %arg6: memref<16x128xbf16, #tpu.memory_space<vmem>>, %arg7: memref<16x128xf32, #tpu.memory_space<vmem>>) attributes {dimension_semantics = [#tpu.dimension_semantics<parallel>, #tpu.dimension_semantics<parallel>, #tpu.dimension_semantics<arbitrary>], iteration_bounds = array<i64: 1, 1, 1>, scalar_prefetch = 0 : i64, scratch_operands = 1 : i64, tpu.core_type = #tpu.core_type<tc>, window_params = [{transform_indices = @transform_0, window_bounds = array<i64: 16, 128>}, {transform_indices = @transform_1, window_bounds = array<i64: 128, 128>}, {transform_indices = @transform_2, window_bounds = array<i64: 1, 128>}, {transform_indices = @transform_3, window_bounds = array<i64: 16, 128>}]} {
    %c0 = arith.constant 0 : index
    %c0_0 = arith.constant 0 : index
    %0 = vector.load %arg3[%c0, %c0_0] : memref<16x128xf32, #tpu.memory_space<vmem>>, vector<16x128xf32>
    %1 = arith.truncf %0 : vector<16x128xf32> to vector<16x128xbf16>
    %c0_1 = arith.constant 0 : index
    %c0_2 = arith.constant 0 : index
    %2 = vector.load %arg4[%c0_1, %c0_2] : memref<128x128xbf16, #tpu.memory_space<vmem>>, vector<128x128xbf16>
    %cst = arith.constant dense<0.000000e+00> : vector<16x128xf32>
    %3 = tpu.matmul %1, %2, %cst {dimension_numbers = #tpu.dot_dimension_numbers<[1], [0], [0], [1], [0, 0, 1, 1], [], []>} : vector<16x128xbf16>, vector<128x128xbf16>, vector<16x128xf32> -> vector<16x128xf32>
    %c0_i32 = arith.constant 0 : i32
    %4 = arith.cmpi eq, %arg2, %c0_i32 : i32
    %5 = arith.extui %4 : i1 to i32
    %c0_i32_3 = arith.constant 0 : i32
    %6 = arith.cmpi ne, %5, %c0_i32_3 : i32
    scf.if %6 {
      %c0_8 = arith.constant 0 : index
      %c0_9 = arith.constant 0 : index
      %13 = vector.load %arg5[%c0_8, %c0_9] : memref<1x128xf32, #tpu.memory_space<vmem>>, vector<1x128xf32>
      %14 = vector.broadcast %13 : vector<1x128xf32> to vector<16x128xf32>
      %15 = arith.addf %3, %14 : vector<16x128xf32>
      %c0_10 = arith.constant 0 : index
      %c0_11 = arith.constant 0 : index
      %16 = vector.load %arg7[%c0_10, %c0_11] : memref<16x128xf32, #tpu.memory_space<vmem>>, vector<16x128xf32>
      tpu.vector_store %arg7[%c0_10, %c0_11], %15 {strides = array<i32>} : memref<16x128xf32, #tpu.memory_space<vmem>>, vector<16x128xf32>,
    } else {
    }
    %c0_i32_4 = arith.constant 0 : i32
    %7 = arith.cmpi sgt, %arg2, %c0_i32_4 : i32
    %8 = arith.extui %7 : i1 to i32
    %c0_i32_5 = arith.constant 0 : i32
    %9 = arith.cmpi ne, %8, %c0_i32_5 : i32
    scf.if %9 {
      %c0_8 = arith.constant 0 : index
      %c0_9 = arith.constant 0 : index
      %13 = vector.load %arg7[%c0_8, %c0_9] : memref<16x128xf32, #tpu.memory_space<vmem>>, vector<16x128xf32>
      %14 = arith.addf %13, %3 : vector<16x128xf32>
      %c0_10 = arith.constant 0 : index
      %c0_11 = arith.constant 0 : index
      %15 = vector.load %arg7[%c0_10, %c0_11] : memref<16x128xf32, #tpu.memory_space<vmem>>, vector<16x128xf32>
      tpu.vector_store %arg7[%c0_10, %c0_11], %14 {strides = array<i32>} : memref<16x128xf32, #tpu.memory_space<vmem>>, vector<16x128xf32>,
    } else {
    }
    %c0_i32_6 = arith.constant 0 : i32
    %10 = arith.cmpi eq, %arg2, %c0_i32_6 : i32
    %11 = arith.extui %10 : i1 to i32
    %c0_i32_7 = arith.constant 0 : i32
    %12 = arith.cmpi ne, %11, %c0_i32_7 : i32
    scf.if %12 {
      %c0_8 = arith.constant 0 : index
      %c0_9 = arith.constant 0 : index
      %13 = vector.load %arg7[%c0_8, %c0_9] : memref<16x128xf32, #tpu.memory_space<vmem>>, vector<16x128xf32>
      %14 = arith.truncf %13 : vector<16x128xf32> to vector<16x128xbf16>
      %c0_10 = arith.constant 0 : index
      %c0_11 = arith.constant 0 : index
      %15 = vector.load %arg6[%c0_10, %c0_11] : memref<16x128xbf16, #tpu.memory_space<vmem>>, vector<16x128xbf16>
      tpu.vector_store %arg6[%c0_10, %c0_11], %14 {strides = array<i32>} : memref<16x128xbf16, #tpu.memory_space<vmem>>, vector<16x128xbf16>,
    } else {
    }
    return
  }
  func.func @transform_0(%arg0: i32, %arg1: i32, %arg2: i32) -> (i32, i32) {
    %c0_i32 = arith.constant 0 : i32
    return %arg0, %arg2 : i32, i32
  }
  func.func @transform_1(%arg0: i32, %arg1: i32, %arg2: i32) -> (i32, i32) {
    %c0_i32 = arith.constant 0 : i32
    return %arg2, %arg1 : i32, i32
  }
  func.func @transform_2(%arg0: i32, %arg1: i32, %arg2: i32) -> (i32, i32) {
    %c0_i32 = arith.constant 0 : i32
    %c0_i32_0 = arith.constant 0 : i32
    return %c0_i32, %arg1 : i32, i32
  }
  func.func @transform_3(%arg0: i32, %arg1: i32, %arg2: i32) -> (i32, i32) {
    %c0_i32 = arith.constant 0 : i32
    return %arg0, %arg1 : i32, i32
  }
}

</mosaic_0001>

<bundles_post_ra>
// kernel: _linear_cast.1
= control target key start
LH: loop header
LB: loop body
LE: loop exit
PB: predicated region body
PF: predicated region fallthrough
CT: control target
= control target key end

     0   :  { %8 = vsyncpa [#allocation4], 0  ;;  %s369_s0 = inlined_call_operand.vmem [shape: f32[16,128], index: 0, kind: input, shape index: {}]   ;;  %s370_s1 = inlined_call_operand.hbm [shape: bf16[128,128], index: 1, kind: input, shape index: {}]   ;;  %s371_s2 = inlined_call_operand.vmem [shape: f32[1,128], index: 2, kind: input, shape index: {}]   ;;  %s372_s3 = inlined_call_operand.hbm [shape: bf16[16,128], index: 3, kind: output, shape index: {}]  }
   0x1   :  { %9 = vsyncpa [#allocation5], 0  ;;  %s304_s12 = smov [#allocation3]   ;;  %s256_s16 = scalar_lea.hbm %s370_s1, 1024 }
   0x2   :  { %s17_s13 = sshll.u32 %s304_s12, 4  ;;  %p257_p0 = scmp.ne.s32.totalorder %s370_s1, %s256_s16  ;;  %s18_s13 = int_to_ptr.vmem [resolvable:$true] %s17_s13 }
   0x3   :  { %p260_p1 = scmp.lt.u32.totalorder %s256_s16, %s370_s1 }
   0x5   :  { %p262_p2 = pnand %p260_p1, %p257_p0 }
   0x7   :  { %265 = shalt.err (!%p262_p2)
}
   0x8   :  { %s266_s21 = scalar_lea.vmem %s18_s13, 1024  ;;  %p271_p4 = scmp.lt.s32.totalorder %s18_s13, %s18_s13 }
   0x9   :  { %p267_p3 = scmp.ne.s32.totalorder %s18_s13, %s266_s21  ;;  %p272_p5 = scmp.lt.s32.totalorder %s266_s21, %s266_s21 }
   0xb   :  { %p273_p6 = por %p272_p5, %p271_p4 }
   0xd   :  { %p274_p7 = pnand %p273_p6, %p267_p3 }
   0xf   :  { %277 = shalt.err (!%p274_p7)
}
  0x10   :  { %s305_s22 = smov 64   ;;  %s306_s23 = smov 4  }
  0x11   :  { %23 = dma.hbm_to_vmem [thread:$0]  %s370_s1, 1024, %s18_s13, [#allocation4], %s305_s22, %s305_s22, %s306_s23  }
  0x12   :  { %300 = dma.done.wait [#allocation4], 1024  }
  0x13   :  { %301 = vsyncadd [#allocation4], 4294966272  ;;  %v307_v0 = vmov 0.0   ;;  %vm308_vm0 = vmmov 0   ;;  %v248_v1 = vld [vmem:[#allocation3] sm:$0xff]   ;;  %v249_v2 = vld [vmem:[#allocation3 + $0x8] sm:$0xff]  }
  0x14   :  { %222 = vmatprep.subr.bf16.mxu0 %v307_v0  ;;  %238 = vmatprep.mubr.msk.bf16.mxu0 %vm308_vm0, %v307_v0  ;;  %v250_v3 = vld [vmem:[#allocation3 + $0x10] sm:$0xff]   ;;  %v251_v4 = vld [vmem:[#allocation3 + $0x18] sm:$0xff]   ;;  %v252_v5 = vld [vmem:[#allocation3 + $0x20] sm:$0xff]   ;;  %s309_s4 = smov [#allocation6]  }
  0x15   :  { %223 = vmatpush3.bf16.msra.mxu0 %v248_v1  ;;  %v253_v6 = vld [vmem:[#allocation3 + $0x28] sm:$0xff]   ;;  %v254_v7 = vld [vmem:[#allocation3 + $0x30] sm:$0xff]   ;;  %v255_v8 = vld [vmem:[#allocation3 + $0x38] sm:$0xff]   ;;  %s183_s5 = sshll.u32 %s309_s4, 4  ;;  %s184_s5 = int_to_ptr.vmem [resolvable:$true] %s183_s5 }
  0x16   :  { %224 = vmatprep.subr.bf16.mxu0 %v307_v0  ;;  %v30_v9 = vld [vmem:[%s369_s0] sm:$0xff]  ;;  %v31_v10 = vld [vmem:[%s369_s0 + $0x8] sm:$0xff]  ;;  %s278_s0 = scalar_lea.vmem %s184_s5, 128  ;;  %p283_p9 = scmp.lt.s32.totalorder %s184_s5, %s184_s5 }
  0x17   :  { %v32_v11 = vpack.c.bf16 %v31_v10, %v30_v9  ;;  %v203_v13 = vld [vmem:[%s371_s2] ss:$0 sm:$0xff]  ;;  %p279_p8 = scmp.ne.s32.totalorder %s184_s5, %s278_s0  ;;  %p284_p10 = scmp.lt.s32.totalorder %s278_s0, %s278_s0 }
  0x19   :  { %225 = vmatpush3.bf16.msra.mxu0 %v249_v2  ;;  %p285_p11 = por %p284_p10, %p283_p9 }
  0x1a   :  { %226 = vmatprep.subr.bf16.mxu0 %v307_v0 }
  0x1b   :  { %p286_p12 = pnand %p285_p11, %p279_p8 }
  0x1d   :  { %227 = vmatpush3.bf16.msra.mxu0 %v250_v3 }
  0x1e   :  { %228 = vmatprep.subr.bf16.mxu0 %v307_v0 }
  0x21   :  { %229 = vmatpush3.bf16.msra.mxu0 %v251_v4 }
  0x22   :  { %230 = vmatprep.subr.bf16.mxu0 %v307_v0 }
  0x25   :  { %231 = vmatpush3.bf16.msra.mxu0 %v252_v5 }
  0x26   :  { %232 = vmatprep.subr.bf16.mxu0 %v307_v0 }
  0x29   :  { %233 = vmatpush3.bf16.msra.mxu0 %v253_v6 }
  0x2a   :  { %234 = vmatprep.subr.bf16.mxu0 %v307_v0 }
  0x2d   :  { %235 = vmatpush3.bf16.msra.mxu0 %v254_v7 }
  0x2e   :  { %236 = vmatprep.subr.bf16.mxu0 %v307_v0 }
  0x31   :  { %237 = vmatpush3.bf16.msra.mxu0 %v255_v8 }
  0x34   :  { %239 = vmatmul.mubr.bf16.vlgmr.msra.gmra.mrb[0].mxu0 %v32_v11 }
 0x107   :  { %v131_v12 = vpop.f32.mrb[0].mxu0 }
 0x108   :  { %v240_v14 = vpop.f32.mrb[1].mxu0  ;;  %v149_v16 = vadd.f32 %v203_v13, %v131_v12 }
 0x109   :  { %v134_v15 = vpop.f32.mrb[2].mxu0 }
 0x10a   :  { %v150_v17 = vadd.f32 %v203_v13, %v134_v15  ;;  %v241_v18 = vpop.f32.mrb[3].mxu0 }
 0x10c   :  { %v211_v19 = vpack.c.bf16 %v150_v17, %v149_v16 }
 0x10e   :  { %212 = vst [vmem:[#allocation6] sm:$0xff] %v211_v19  }
 0x10f   :  { %289 = shalt.err (!%p286_p12)
}
 0x110   :  { %s290_s2 = scalar_lea.hbm %s372_s3, 128 }
 0x111   :  { %p291_p13 = scmp.ne.s32.totalorder %s372_s3, %s290_s2  ;;  %p294_p0 = scmp.lt.u32.totalorder %s290_s2, %s372_s3 }
 0x113   :  { %p296_p1 = pnand %p294_p0, %p291_p13 }
 0x115   :  { %299 = shalt.err (!%p296_p1)
}
 0x116   :  { %189 = dma.vmem_to_hbm [thread:$0]  %s184_s5, 128, %s372_s3, [#allocation5], %s305_s22, %s305_s22, %s306_s23  }
 0x117   :  { %302 = dma.done.wait [#allocation5], 128  }
 0x118   :  { %303 = vsyncadd [#allocation5], 4294967168 }
 0x119   :  { %193 = vsyncpa [#allocation4], 1 }
 0x11a   :  { %194 = vsyncpa [#allocation5], 1 }

</bundles_post_ra>
